<compile_context>
chip_gen: v7x
topology: tpu7x:2x2x1
jax: 0.10.0
libtpu: 0.0.40
codegen_flags: <defaults>
</compile_context>

<pallas_src>
import functools

import jax
import jax.numpy as jnp
import numpy as np
from jax.experimental import pallas as pl
from jax.experimental.pallas import tpu as pltpu

COUT = 16   # output channels of conv1
K = 3       # conv kernel size
EPS = 1e-5  # BatchNorm eps (PyTorch default)


def _lane_pad(n):
    return ((n + 127) // 128) * 128


def _tpu_params():
    """(mxu_depth, slab_budget_bytes, vmem_limit_cap_bytes) per TPU generation."""
    kind = ""
    try:
        kind = jax.devices()[0].device_kind.lower()
    except Exception:
        pass
    if "v5" in kind:                    # v5e/v5p: 128-deep MXU, 128 MiB VMEM
        return 128, 64 * 2**20, 96 * 2**20
    if "v6" in kind:                    # v6e: 256-deep MXU, 128 MiB VMEM
        return 256, 64 * 2**20, 96 * 2**20
    if "v4" in kind or "v3" in kind or "v2" in kind:
        return 128, 24 * 2**20, 48 * 2**20
    # v7x (64 MiB VMEM / TC) and unknown devices: conservative budget.
    return 256, 18 * 2**20, 44 * 2**20


def _choose_ws(W, Cin, mxu_depth):
    """Largest W-strip Ws (Ws | W, Ws % 8 == 0) with (Ws+2)*Cin <= MXU depth."""
    valid = [ws for ws in range(8, W + 1, 8) if W % ws == 0]
    if not valid:
        valid = [W]
    fitting = [ws for ws in valid if (ws + 2) * Cin <= mxu_depth]
    return max(fitting) if fitting else min(valid)


def _vmem_estimates(td, H, W, Cin, Ws, WpCp):
    """Rough per-grid-step VMEM footprint (bytes) of the two kernels."""
    W16 = W * COUT
    Ws16 = Ws * COUT
    Ks = (Ws + 2) * Cin
    x_blk = (td + 2) * (H + 2) * WpCp * 2      # bf16 input slab
    o_blk = td * H * W16 * 2                   # bf16 conv-out block
    wts = 2 * 9 * Ks * Ws16 * 2                # strip weights (default double-buffered, small)
    stats = 2 * 2 * W16 * 4 * 2                # psum / pssq blocks
    work = 4 * H * Ws16 * 4                    # in-flight f32 strip accumulator headroom
    conv_est = 2 * x_blk + 2 * o_blk + wts + stats + work + (1 << 20)
    bn_est = 2 * o_blk + 2 * td * H * W16 * 4 + (1 << 20)   # bf16 in + f32 out
    return conv_est, bn_est


def _choose_td(N, D, H, W, Cin, Ws, WpCp, budget_bytes):
    """Largest depth slab TD (divisor of D) fitting the per-generation budget."""
    divisors = [td for td in range(1, D + 1) if D % td == 0]
    fitting = [td for td in divisors
               if max(_vmem_estimates(td, H, W, Cin, Ws, WpCp)) <= budget_bytes]
    if not fitting:
        fitting = [1]
    best = max(fitting)
    # v7x megacore: make sure the (all-"parallel") grid has at least 2 steps.
    if N * (D // best) < 2:
        two_step = [td for td in fitting if D // td >= 2]
        if two_step:
            best = max(two_step)
    return best


# ---------------------------------------------------------------------------
# Kernel 1: strip-tiled banded conv (9 taps / strip) + bias + partial BN stats.
# ---------------------------------------------------------------------------
def _conv_stats_kernel(x_ref, w_ref, b_ref, out_ref, psum_ref, pssq_ref,
                       *, TD, H, W, Cin, Ws):
    """One (sample, depth-slab) grid step.

    x_ref   : (1, 1, TD+2, H+2, WpCp)   bf16  padded input slab (W,Cin folded, lane padded)
    w_ref   : (9, (Ws+2)*Cin, Ws*16)    bf16  banded strip weight (reused for every strip)
    b_ref   : (1, Ws*16)                f32   conv bias tiled over one strip
    out_ref : (1, 1, TD, H, W*16)       bf16  lane-dense conv output
    psum_ref/pssq_ref : (1, 1, 1, W*16) f32   per-step bias-shifted partial BN sums
    """
    Ks = (Ws + 2) * Cin
    Ws16 = Ws * COUT
    n_strips = W // Ws
    bias_row = b_ref[0]                               # (Ws16,) f32

    psum_ref[...] = jnp.zeros_like(psum_ref)
    pssq_ref[...] = jnp.zeros_like(pssq_ref)

    def plane(d, carry):
        # One depth plane of the output: 2-D contiguous matmuls only (no
        # strided-slice reshape copies); 9 taps accumulate in a value and are
        # stored exactly once per (plane, strip).
        for s in range(n_strips):
            ks = s * Ws * Cin                          # minor-axis (lane) input offset
            cs = s * Ws16                              # minor-axis output offset
            acc = None
            for t in range(9):
                kd, kh = t // 3, t % 3
                lhs = x_ref[0, 0, d + kd, kh:kh + H, ks:ks + Ks]      # (H, Ks) bf16
                con = jnp.dot(lhs, w_ref[t], preferred_element_type=jnp.float32)
                acc = con if acc is None else acc + con
            acc = acc + bias_row                                       # (H, Ws16) f32
            y = acc.astype(out_ref.dtype)
            out_ref[0, 0, d, :, cs:cs + Ws16] = y
            # Bias-shifted partial sums over the bf16-rounded values: self-
            # consistent with what kernel 2 normalizes, and the shift removes
            # the bias contribution from E[x^2]-E[x]^2 cancellation.
            z = y.astype(jnp.float32) - bias_row
            psum_ref[0, 0, :, cs:cs + Ws16] += jnp.sum(z, axis=0, keepdims=True)
            pssq_ref[0, 0, :, cs:cs + Ws16] += jnp.sum(z * z, axis=0, keepdims=True)
        return carry

    jax.lax.fori_loop(0, TD, plane, 0)


# ---------------------------------------------------------------------------
# Kernel 2: fused BatchNorm affine (per-lane scale/shift) + ELU/ReLU.
# ---------------------------------------------------------------------------
def _bn_elu_kernel(y_ref, scale_ref, shift_ref, o_ref, *, elu):
    v = y_ref[0, 0].astype(jnp.float32) * scale_ref[0] + shift_ref[0]
    if elu:
        o_ref[0, 0] = jnp.where(v > 0, v, jnp.expm1(v))    # ELU, alpha=1
    else:
        o_ref[0, 0] = jnp.maximum(v, 0.0)                  # ReLU (ELUCons(elu=False))


def input_transition_forward(x_ncdhw, weight, bias, gamma, beta, *,
                             elu=True, return_channels_last=False):
    """x_ncdhw: (N, Cin, D, H, W); weight: (16, Cin, 3, 3, 3); bias/gamma/beta: (16,).

    Conv3d(k=3, pad=1) -> BatchNorm3d (training-mode batch stats) -> ELU.
    MXU operands and the conv_out intermediate are bf16; statistics, bias and
    all BN affine math are f32; the returned activation is f32 NCDHW (or NDHWC
    channels-last if return_channels_last=True, which skips the final relayout).
    """
    N, Cin, D, H, W = x_ncdhw.shape
    assert W % 8 == 0, "W*16 must be a multiple of 128 (lane-dense layout)"
    W16 = W * COUT
    WpC = (W + 2) * Cin
    WpCp = _lane_pad(WpC)

    mxu_depth, slab_budget, vmem_cap = _tpu_params()
    Ws = _choose_ws(W, Cin, mxu_depth)
    Ks = (Ws + 2) * Cin
    Ws16 = Ws * COUT
    TD = _choose_td(N, D, H, W, Cin, Ws, WpCp, slab_budget)
    NS = D // TD
    conv_est, bn_est = _vmem_estimates(TD, H, W, Cin, Ws, WpCp)
    vmem_limit = int(min(max(32 * 2**20, 2 * max(conv_est, bn_est)), vmem_cap))

    # ---- host-side layout prep (bf16, lane-dense) ---------------------------
    x_ndhwc = jnp.transpose(x_ncdhw.astype(jnp.float32), (0, 2, 3, 4, 1))
    x_ndhwc = x_ndhwc.astype(jnp.bfloat16)
    x_pad = jnp.pad(x_ndhwc, ((0, 0), (1, 1), (1, 1), (1, 1), (0, 0)))
    x_pad = x_pad.reshape(N, D + 2, H + 2, WpC)
    if WpCp != WpC:
        x_pad = jnp.pad(x_pad, ((0, 0), (0, 0), (0, 0), (0, WpCp - WpC)))
    # Overlapping depth slabs with a 1-plane halo.
    # TODO(synk): replace with an element-offset depth index_map / in-kernel
    # halo DMA to avoid the (TD+2)/TD input duplication in HBM.
    slab_idx = jnp.arange(NS)[:, None] * TD + jnp.arange(TD + 2)[None, :]
    x_slabs = x_pad[:, slab_idx]                       # (N, NS, TD+2, H+2, WpCp)

    # Banded strip weight (translation-invariant, reused for every strip):
    # Bs[kd*3+kh, (w+kw)*Cin + ci, w*16 + co] = weight[co, ci, kd, kh, kw], w < Ws.
    tap = jnp.transpose(weight.astype(jnp.float32), (2, 3, 4, 1, 0))   # (kd,kh,kw,ci,co)
    tap9 = tap.reshape(9, 3 * Cin, COUT)
    Bs = jnp.zeros((9, Ks, Ws16), jnp.float32)
    for w in range(Ws):
        Bs = Bs.at[:, w * Cin:(w + 3) * Cin, w * COUT:(w + 1) * COUT].set(tap9)
    Bs = Bs.astype(jnp.bfloat16)
    b_strip = jnp.tile(bias.astype(jnp.float32), Ws).reshape(1, Ws16)

    # ---- kernel 1: strip-tiled conv + bias + partial BN statistics ----------
    conv_fn = pl.pallas_call(
        functools.partial(_conv_stats_kernel, TD=TD, H=H, W=W, Cin=Cin, Ws=Ws),
        out_shape=(
            jax.ShapeDtypeStruct((N, NS, TD, H, W16), jnp.bfloat16),
            jax.ShapeDtypeStruct((N, NS, 1, W16), jnp.float32),
            jax.ShapeDtypeStruct((N, NS, 1, W16), jnp.float32),
        ),
        grid_spec=pltpu.PrefetchScalarGridSpec(
            num_scalar_prefetch=0,
            grid=(N, NS),
            in_specs=[
                pl.BlockSpec((1, 1, TD + 2, H + 2, WpCp),
                             lambda n, s: (n, s, 0, 0, 0)),
                pl.BlockSpec((9, Ks, Ws16), lambda n, s: (0, 0, 0)),
                pl.BlockSpec((1, Ws16), lambda n, s: (0, 0)),
            ],
            out_specs=(
                pl.BlockSpec((1, 1, TD, H, W16), lambda n, s: (n, s, 0, 0, 0)),
                pl.BlockSpec((1, 1, 1, W16), lambda n, s: (n, s, 0, 0)),
                pl.BlockSpec((1, 1, 1, W16), lambda n, s: (n, s, 0, 0)),
            ),
        ),
        compiler_params=pltpu.CompilerParams(
            dimension_semantics=("parallel", "parallel"),
            vmem_limit_bytes=vmem_limit),
    )
    conv_out, psum, pssq = conv_fn(x_slabs, Bs, b_strip)

    # ---- BatchNorm statistics (training mode, biased variance) --------------
    # psum/pssq are bias-shifted sums of the bf16-rounded conv output:
    #   z = y - bias  =>  mean(y) = mean(z) + bias,  var(y) = var(z).
    count = float(N * D * H * W)
    z_sum = psum.sum(axis=(0, 1, 2)).reshape(W, COUT).sum(axis=0)
    z_ssq = pssq.sum(axis=(0, 1, 2)).reshape(W, COUT).sum(axis=0)
    mean_z = z_sum / count
    var = jnp.maximum(z_ssq / count - mean_z * mean_z, 0.0)   # clamp E[z^2]-E[z]^2
    mean = mean_z + bias.astype(jnp.float32)
    inv_std = jax.lax.rsqrt(var + EPS)
    scale_c = gamma.astype(jnp.float32) * inv_std
    shift_c = beta.astype(jnp.float32) - mean * scale_c
    scale = jnp.tile(scale_c, W).reshape(1, W16)
    shift = jnp.tile(shift_c, W).reshape(1, W16)

    # ---- kernel 2: fused BN affine + ELU (lane-dense, memory-bound) ---------
    bn_fn = pl.pallas_call(
        functools.partial(_bn_elu_kernel, elu=elu),
        out_shape=jax.ShapeDtypeStruct((N, NS, TD, H, W16), jnp.float32),
        grid_spec=pltpu.PrefetchScalarGridSpec(
            num_scalar_prefetch=0,
            grid=(N, NS),
            in_specs=[
                pl.BlockSpec((1, 1, TD, H, W16), lambda n, s: (n, s, 0, 0, 0)),
                pl.BlockSpec((1, W16), lambda n, s: (0, 0)),
                pl.BlockSpec((1, W16), lambda n, s: (0, 0)),
            ],
            out_specs=pl.BlockSpec((1, 1, TD, H, W16), lambda n, s: (n, s, 0, 0, 0)),
        ),
        compiler_params=pltpu.CompilerParams(
            dimension_semantics=("parallel", "parallel"),
            vmem_limit_bytes=vmem_limit),
    )
    out = bn_fn(conv_out, scale, shift)

    # (N, NS, TD, H, W*16) == (N, D, H, W, 16) in row-major order.
    out = out.reshape(N, D, H, W, COUT)
    if return_channels_last:
        return out
    # Full f32 relayout of the largest tensor — kept only for NCDHW module
    # semantics; use return_channels_last=True to fuse into an NDHWC consumer.
    return jnp.transpose(out, (0, 4, 1, 2, 3))


# ---------------------------------------------------------------------------
# Pure-JAX reference (validation only)
# ---------------------------------------------------------------------------
def _reference(x, weight, bias, gamma, beta):
    y = jax.lax.conv_general_dilated(
        x, weight, window_strides=(1, 1, 1),
        padding=((1, 1), (1, 1), (1, 1)),
        dimension_numbers=("NCDHW", "OIDHW", "NCDHW"))
    y = y + bias[None, :, None, None, None]
    mean = jnp.mean(y, axis=(0, 2, 3, 4), keepdims=True)
    var = jnp.mean((y - mean) ** 2, axis=(0, 2, 3, 4), keepdims=True)
    z = (y - mean) / jnp.sqrt(var + EPS)
    z = z * gamma[None, :, None, None, None] + beta[None, :, None, None, None]
    return jnp.where(z > 0, z, jnp.expm1(z))


if __name__ == "__main__":
    key = jax.random.PRNGKey(0)
    kx, kw, kb, kg, kbe = jax.random.split(key, 5)

    N, Cin, D, H, W = 2, 4, 8, 8, 8
    x = jax.random.normal(kx, (N, Cin, D, H, W), jnp.float32)

    # Deterministic parameter init (Conv3d default-style uniform bounds)
    fan_in = Cin * K * K * K
    bound = 1.0 / np.sqrt(fan_in)
    weight = jax.random.uniform(kw, (COUT, Cin, K, K, K), jnp.float32, -bound, bound)
    bias = jax.random.uniform(kb, (COUT,), jnp.float32, -bound, bound)
    gamma = 1.0 + 0.1 * jax.random.normal(kg, (COUT,), jnp.float32)
    beta = 0.1 * jax.random.normal(kbe, (COUT,), jnp.float32)

    out = input_transition_forward(x, weight, bias, gamma, beta)
    out = jax.block_until_ready(out)
    assert out.shape == (N, COUT, D, H, W), out.shape

    # Compare against the f32 module semantics.  The kernel uses bf16 MXU
    # operands and a bf16 conv_out intermediate, so the error budget is the
    # bf16 mixed-precision one (~1 bf16 ulp amplified by gamma/std); wrong
    # taps/stats would show as O(0.3+) errors and still be caught.
    ref = _reference(x, weight, bias, gamma, beta)
    out_np = np.asarray(out)
    ref_np = np.asarray(ref)
    max_err = float(np.max(np.abs(out_np - ref_np)))
    rel_fro = float(np.linalg.norm(out_np - ref_np) / np.linalg.norm(ref_np))
    assert max_err < 1e-1, ("max abs err", max_err)
    assert rel_fro < 2e-2, ("relative Frobenius err", rel_fro)

    print("KERNEL_OK")
</pallas_src>

<mosaic_0001>
module attributes {stable_mosaic.version = 11 : i64} {
  func.func @_conv_stats_kernel(%arg0: i32, %arg1: i32, %arg2: memref<1x1x10x10x128xbf16, #tpu.memory_space<vmem>>, %arg3: memref<9x40x128xbf16, #tpu.memory_space<vmem>>, %arg4: memref<1x128xf32, #tpu.memory_space<vmem>>, %arg5: memref<1x1x8x8x128xbf16, #tpu.memory_space<vmem>>, %arg6: memref<1x1x1x128xf32, #tpu.memory_space<vmem>>, %arg7: memref<1x1x1x128xf32, #tpu.memory_space<vmem>>) attributes {dimension_semantics = [#tpu.dimension_semantics<parallel>, #tpu.dimension_semantics<parallel>], iteration_bounds = array<i64: 2, 1>, scalar_prefetch = 0 : i64, scratch_operands = 0 : i64, tpu.core_type = #tpu.core_type<tc>, window_params = [{transform_indices = @transform_0, window_bounds = array<i64: 1, 1, 10, 10, 128>}, {pipeline_mode = #tpu.pipeline_mode<synchronous>, transform_indices = @transform_1, window_bounds = array<i64: 9, 40, 128>}, {pipeline_mode = #tpu.pipeline_mode<synchronous>, transform_indices = @transform_2, window_bounds = array<i64: 1, 128>}, {transform_indices = @transform_3, window_bounds = array<i64: 1, 1, 8, 8, 128>}, {transform_indices = @transform_4, window_bounds = array<i64: 1, 1, 1, 128>}, {transform_indices = @transform_5, window_bounds = array<i64: 1, 1, 1, 128>}]} {
    %c0 = arith.constant 0 : index
    %c0_0 = arith.constant 0 : index
    %0 = vector.load %arg4[%c0, %c0_0] : memref<1x128xf32, #tpu.memory_space<vmem>>, vector<1x128xf32>
    %1 = vector.shape_cast %0 : vector<1x128xf32> to vector<128xf32>
    %cst = arith.constant 0.000000e+00 : f32
    %2 = vector.broadcast %cst : f32 to vector<1x1x1x128xf32>
    %c0_1 = arith.constant 0 : index
    %c0_2 = arith.constant 0 : index
    %c0_3 = arith.constant 0 : index
    %c0_4 = arith.constant 0 : index
    %3 = vector.load %arg6[%c0_1, %c0_2, %c0_3, %c0_4] : memref<1x1x1x128xf32, #tpu.memory_space<vmem>>, vector<1x1x1x128xf32>
    tpu.vector_store %arg6[%c0_1, %c0_2, %c0_3, %c0_4], %2 {strides = array<i32>} : memref<1x1x1x128xf32, #tpu.memory_space<vmem>>, vector<1x1x1x128xf32>,
    %cst_5 = arith.constant 0.000000e+00 : f32
    %4 = vector.broadcast %cst_5 : f32 to vector<1x1x1x128xf32>
    %c0_6 = arith.constant 0 : index
    %c0_7 = arith.constant 0 : index
    %c0_8 = arith.constant 0 : index
    %c0_9 = arith.constant 0 : index
    %5 = vector.load %arg7[%c0_6, %c0_7, %c0_8, %c0_9] : memref<1x1x1x128xf32, #tpu.memory_space<vmem>>, vector<1x1x1x128xf32>
    tpu.vector_store %arg7[%c0_6, %c0_7, %c0_8, %c0_9], %4 {strides = array<i32>} : memref<1x1x1x128xf32, #tpu.memory_space<vmem>>, vector<1x1x1x128xf32>,
    %c0_i32 = arith.constant 0 : i32
    %c8_i32 = arith.constant 8 : i32
    %6 = arith.addi %c0_i32, %c8_i32 : i32
    %c1_i32 = arith.constant 1 : i32
    scf.for %arg8 = %c0_i32 to %6 step %c1_i32  : i32 {
      %c0_i32_11 = arith.constant 0 : i32
      %7 = arith.addi %arg8, %c0_i32_11 : i32
      %c0_12 = arith.constant 0 : index
      %c0_13 = arith.constant 0 : index
      %8 = arith.index_cast %7 : i32 to index
      %c0_14 = arith.constant 0 : index
      %c0_15 = arith.constant 0 : index
      %9 = vector.load %arg2[%c0_12, %c0_13, %8, %c0_14, %c0_15] : memref<1x1x10x10x128xbf16, #tpu.memory_space<vmem>>, vector<1x1x1x8x40xbf16>
      %10 = vector.shape_cast %9 : vector<1x1x1x8x40xbf16> to vector<8x40xbf16>
      %c0_16 = arith.constant 0 : index
      %c0_17 = arith.constant 0 : index
      %c0_18 = arith.constant 0 : index
      %11 = vector.load %arg3[%c0_16, %c0_17, %c0_18] : memref<9x40x128xbf16, #tpu.memory_space<vmem>>, vector<1x40x128xbf16>
      %12 = vector.shape_cast %11 : vector<1x40x128xbf16> to vector<40x128xbf16>
      %cst_19 = arith.constant dense<0.000000e+00> : vector<8x128xf32>
      %13 = tpu.matmul %10, %12, %cst_19 {dimension_numbers = #tpu.dot_dimension_numbers<[1], [0], [0], [1], [0, 0, 1, 1], [], []>} : vector<8x40xbf16>, vector<40x128xbf16>, vector<8x128xf32> -> vector<8x128xf32>
      %c0_i32_20 = arith.constant 0 : i32
      %14 = arith.addi %arg8, %c0_i32_20 : i32
      %c0_21 = arith.constant 0 : index
      %c0_22 = arith.constant 0 : index
      %15 = arith.index_cast %14 : i32 to index
      %c1 = arith.constant 1 : index
      %c0_23 = arith.constant 0 : index
      %16 = vector.load %arg2[%c0_21, %c0_22, %15, %c1, %c0_23] : memref<1x1x10x10x128xbf16, #tpu.memory_space<vmem>>, vector<1x1x1x8x40xbf16>
      %17 = vector.shape_cast %16 : vector<1x1x1x8x40xbf16> to vector<8x40xbf16>
      %c1_24 = arith.constant 1 : index
      %c0_25 = arith.constant 0 : index
      %c0_26 = arith.constant 0 : index
      %18 = vector.load %arg3[%c1_24, %c0_25, %c0_26] : memref<9x40x128xbf16, #tpu.memory_space<vmem>>, vector<1x40x128xbf16>
      %19 = vector.shape_cast %18 : vector<1x40x128xbf16> to vector<40x128xbf16>
      %cst_27 = arith.constant dense<0.000000e+00> : vector<8x128xf32>
      %20 = tpu.matmul %17, %19, %cst_27 {dimension_numbers = #tpu.dot_dimension_numbers<[1], [0], [0], [1], [0, 0, 1, 1], [], []>} : vector<8x40xbf16>, vector<40x128xbf16>, vector<8x128xf32> -> vector<8x128xf32>
      %21 = arith.addf %13, %20 : vector<8x128xf32>
      %c0_i32_28 = arith.constant 0 : i32
      %22 = arith.addi %arg8, %c0_i32_28 : i32
      %c0_29 = arith.constant 0 : index
      %c0_30 = arith.constant 0 : index
      %23 = arith.index_cast %22 : i32 to index
      %c2 = arith.constant 2 : index
      %c0_31 = arith.constant 0 : index
      %24 = vector.load %arg2[%c0_29, %c0_30, %23, %c2, %c0_31] : memref<1x1x10x10x128xbf16, #tpu.memory_space<vmem>>, vector<1x1x1x8x40xbf16>
      %25 = vector.shape_cast %24 : vector<1x1x1x8x40xbf16> to vector<8x40xbf16>
      %c2_32 = arith.constant 2 : index
      %c0_33 = arith.constant 0 : index
      %c0_34 = arith.constant 0 : index
      %26 = vector.load %arg3[%c2_32, %c0_33, %c0_34] : memref<9x40x128xbf16, #tpu.memory_space<vmem>>, vector<1x40x128xbf16>
      %27 = vector.shape_cast %26 : vector<1x40x128xbf16> to vector<40x128xbf16>
      %cst_35 = arith.constant dense<0.000000e+00> : vector<8x128xf32>
      %28 = tpu.matmul %25, %27, %cst_35 {dimension_numbers = #tpu.dot_dimension_numbers<[1], [0], [0], [1], [0, 0, 1, 1], [], []>} : vector<8x40xbf16>, vector<40x128xbf16>, vector<8x128xf32> -> vector<8x128xf32>
      %29 = arith.addf %21, %28 : vector<8x128xf32>
      %c1_i32_36 = arith.constant 1 : i32
      %30 = arith.addi %arg8, %c1_i32_36 : i32
      %c0_37 = arith.constant 0 : index
      %c0_38 = arith.constant 0 : index
      %31 = arith.index_cast %30 : i32 to index
      %c0_39 = arith.constant 0 : index
      %c0_40 = arith.constant 0 : index
      %32 = vector.load %arg2[%c0_37, %c0_38, %31, %c0_39, %c0_40] : memref<1x1x10x10x128xbf16, #tpu.memory_space<vmem>>, vector<1x1x1x8x40xbf16>
      %33 = vector.shape_cast %32 : vector<1x1x1x8x40xbf16> to vector<8x40xbf16>
      %c3 = arith.constant 3 : index
      %c0_41 = arith.constant 0 : index
      %c0_42 = arith.constant 0 : index
      %34 = vector.load %arg3[%c3, %c0_41, %c0_42] : memref<9x40x128xbf16, #tpu.memory_space<vmem>>, vector<1x40x128xbf16>
      %35 = vector.shape_cast %34 : vector<1x40x128xbf16> to vector<40x128xbf16>
      %cst_43 = arith.constant dense<0.000000e+00> : vector<8x128xf32>
      %36 = tpu.matmul %33, %35, %cst_43 {dimension_numbers = #tpu.dot_dimension_numbers<[1], [0], [0], [1], [0, 0, 1, 1], [], []>} : vector<8x40xbf16>, vector<40x128xbf16>, vector<8x128xf32> -> vector<8x128xf32>
      %37 = arith.addf %29, %36 : vector<8x128xf32>
      %c1_i32_44 = arith.constant 1 : i32
      %38 = arith.addi %arg8, %c1_i32_44 : i32
      %c0_45 = arith.constant 0 : index
      %c0_46 = arith.constant 0 : index
      %39 = arith.index_cast %38 : i32 to index
      %c1_47 = arith.constant 1 : index
      %c0_48 = arith.constant 0 : index
      %40 = vector.load %arg2[%c0_45, %c0_46, %39, %c1_47, %c0_48] : memref<1x1x10x10x128xbf16, #tpu.memory_space<vmem>>, vector<1x1x1x8x40xbf16>
      %41 = vector.shape_cast %40 : vector<1x1x1x8x40xbf16> to vector<8x40xbf16>
      %c4 = arith.constant 4 : index
      %c0_49 = arith.constant 0 : index
      %c0_50 = arith.constant 0 : index
      %42 = vector.load %arg3[%c4, %c0_49, %c0_50] : memref<9x40x128xbf16, #tpu.memory_space<vmem>>, vector<1x40x128xbf16>
      %43 = vector.shape_cast %42 : vector<1x40x128xbf16> to vector<40x128xbf16>
      %cst_51 = arith.constant dense<0.000000e+00> : vector<8x128xf32>
      %44 = tpu.matmul %41, %43, %cst_51 {dimension_numbers = #tpu.dot_dimension_numbers<[1], [0], [0], [1], [0, 0, 1, 1], [], []>} : vector<8x40xbf16>, vector<40x128xbf16>, vector<8x128xf32> -> vector<8x128xf32>
      %45 = arith.addf %37, %44 : vector<8x128xf32>
      %c1_i32_52 = arith.constant 1 : i32
      %46 = arith.addi %arg8, %c1_i32_52 : i32
      %c0_53 = arith.constant 0 : index
      %c0_54 = arith.constant 0 : index
      %47 = arith.index_cast %46 : i32 to index
      %c2_55 = arith.constant 2 : index
      %c0_56 = arith.constant 0 : index
      %48 = vector.load %arg2[%c0_53, %c0_54, %47, %c2_55, %c0_56] : memref<1x1x10x10x128xbf16, #tpu.memory_space<vmem>>, vector<1x1x1x8x40xbf16>
      %49 = vector.shape_cast %48 : vector<1x1x1x8x40xbf16> to vector<8x40xbf16>
      %c5 = arith.constant 5 : index
      %c0_57 = arith.constant 0 : index
      %c0_58 = arith.constant 0 : index
      %50 = vector.load %arg3[%c5, %c0_57, %c0_58] : memref<9x40x128xbf16, #tpu.memory_space<vmem>>, vector<1x40x128xbf16>
      %51 = vector.shape_cast %50 : vector<1x40x128xbf16> to vector<40x128xbf16>
      %cst_59 = arith.constant dense<0.000000e+00> : vector<8x128xf32>
      %52 = tpu.matmul %49, %51, %cst_59 {dimension_numbers = #tpu.dot_dimension_numbers<[1], [0], [0], [1], [0, 0, 1, 1], [], []>} : vector<8x40xbf16>, vector<40x128xbf16>, vector<8x128xf32> -> vector<8x128xf32>
      %53 = arith.addf %45, %52 : vector<8x128xf32>
      %c2_i32 = arith.constant 2 : i32
      %54 = arith.addi %arg8, %c2_i32 : i32
      %c0_60 = arith.constant 0 : index
      %c0_61 = arith.constant 0 : index
      %55 = arith.index_cast %54 : i32 to index
      %c0_62 = arith.constant 0 : index
      %c0_63 = arith.constant 0 : index
      %56 = vector.load %arg2[%c0_60, %c0_61, %55, %c0_62, %c0_63] : memref<1x1x10x10x128xbf16, #tpu.memory_space<vmem>>, vector<1x1x1x8x40xbf16>
      %57 = vector.shape_cast %56 : vector<1x1x1x8x40xbf16> to vector<8x40xbf16>
      %c6 = arith.constant 6 : index
      %c0_64 = arith.constant 0 : index
      %c0_65 = arith.constant 0 : index
      %58 = vector.load %arg3[%c6, %c0_64, %c0_65] : memref<9x40x128xbf16, #tpu.memory_space<vmem>>, vector<1x40x128xbf16>
      %59 = vector.shape_cast %58 : vector<1x40x128xbf16> to vector<40x128xbf16>
      %cst_66 = arith.constant dense<0.000000e+00> : vector<8x128xf32>
      %60 = tpu.matmul %57, %59, %cst_66 {dimension_numbers = #tpu.dot_dimension_numbers<[1], [0], [0], [1], [0, 0, 1, 1], [], []>} : vector<8x40xbf16>, vector<40x128xbf16>, vector<8x128xf32> -> vector<8x128xf32>
      %61 = arith.addf %53, %60 : vector<8x128xf32>
      %c2_i32_67 = arith.constant 2 : i32
      %62 = arith.addi %arg8, %c2_i32_67 : i32
      %c0_68 = arith.constant 0 : index
      %c0_69 = arith.constant 0 : index
      %63 = arith.index_cast %62 : i32 to index
      %c1_70 = arith.constant 1 : index
      %c0_71 = arith.constant 0 : index
      %64 = vector.load %arg2[%c0_68, %c0_69, %63, %c1_70, %c0_71] : memref<1x1x10x10x128xbf16, #tpu.memory_space<vmem>>, vector<1x1x1x8x40xbf16>
      %65 = vector.shape_cast %64 : vector<1x1x1x8x40xbf16> to vector<8x40xbf16>
      %c7 = arith.constant 7 : index
      %c0_72 = arith.constant 0 : index
      %c0_73 = arith.constant 0 : index
      %66 = vector.load %arg3[%c7, %c0_72, %c0_73] : memref<9x40x128xbf16, #tpu.memory_space<vmem>>, vector<1x40x128xbf16>
      %67 = vector.shape_cast %66 : vector<1x40x128xbf16> to vector<40x128xbf16>
      %cst_74 = arith.constant dense<0.000000e+00> : vector<8x128xf32>
      %68 = tpu.matmul %65, %67, %cst_74 {dimension_numbers = #tpu.dot_dimension_numbers<[1], [0], [0], [1], [0, 0, 1, 1], [], []>} : vector<8x40xbf16>, vector<40x128xbf16>, vector<8x128xf32> -> vector<8x128xf32>
      %69 = arith.addf %61, %68 : vector<8x128xf32>
      %c2_i32_75 = arith.constant 2 : i32
      %70 = arith.addi %arg8, %c2_i32_75 : i32
      %c0_76 = arith.constant 0 : index
      %c0_77 = arith.constant 0 : index
      %71 = arith.index_cast %70 : i32 to index
      %c2_78 = arith.constant 2 : index
      %c0_79 = arith.constant 0 : index
      %72 = vector.load %arg2[%c0_76, %c0_77, %71, %c2_78, %c0_79] : memref<1x1x10x10x128xbf16, #tpu.memory_space<vmem>>, vector<1x1x1x8x40xbf16>
      %73 = vector.shape_cast %72 : vector<1x1x1x8x40xbf16> to vector<8x40xbf16>
      %c8 = arith.constant 8 : index
      %c0_80 = arith.constant 0 : index
      %c0_81 = arith.constant 0 : index
      %74 = vector.load %arg3[%c8, %c0_80, %c0_81] : memref<9x40x128xbf16, #tpu.memory_space<vmem>>, vector<1x40x128xbf16>
      %75 = vector.shape_cast %74 : vector<1x40x128xbf16> to vector<40x128xbf16>
      %cst_82 = arith.constant dense<0.000000e+00> : vector<8x128xf32>
      %76 = tpu.matmul %73, %75, %cst_82 {dimension_numbers = #tpu.dot_dimension_numbers<[1], [0], [0], [1], [0, 0, 1, 1], [], []>} : vector<8x40xbf16>, vector<40x128xbf16>, vector<8x128xf32> -> vector<8x128xf32>
      %77 = arith.addf %69, %76 : vector<8x128xf32>
      %78 = vector.shape_cast %1 : vector<128xf32> to vector<1x128xf32>
      %79 = vector.broadcast %78 : vector<1x128xf32> to vector<8x128xf32>
      %80 = arith.addf %77, %79 : vector<8x128xf32>
      %81 = arith.truncf %80 : vector<8x128xf32> to vector<8x128xbf16>
      %c0_83 = arith.constant 0 : index
      %c0_84 = arith.constant 0 : index
      %82 = arith.index_cast %arg8 : i32 to index
      %c0_85 = arith.constant 0 : index
      %c0_86 = arith.constant 0 : index
      %83 = vector.load %arg5[%c0_83, %c0_84, %82, %c0_85, %c0_86] : memref<1x1x8x8x128xbf16, #tpu.memory_space<vmem>>, vector<1x1x1x8x128xbf16>
      %84 = vector.shape_cast %83 : vector<1x1x1x8x128xbf16> to vector<8x128xbf16>
      %85 = vector.shape_cast %81 : vector<8x128xbf16> to vector<1x1x1x8x128xbf16>
      tpu.vector_store %arg5[%c0_83, %c0_84, %82, %c0_85, %c0_86], %85 {strides = array<i32>} : memref<1x1x8x8x128xbf16, #tpu.memory_space<vmem>>, vector<1x1x1x8x128xbf16>,
      %86 = arith.extf %81 : vector<8x128xbf16> to vector<8x128xf32>
      %87 = vector.shape_cast %1 : vector<128xf32> to vector<1x128xf32>
      %88 = vector.broadcast %87 : vector<1x128xf32> to vector<8x128xf32>
      %89 = arith.subf %86, %88 : vector<8x128xf32>
      %c0_87 = arith.constant 0 : index
      %c0_88 = arith.constant 0 : index
      %c0_89 = arith.constant 0 : index
      %c0_90 = arith.constant 0 : index
      %90 = vector.load %arg6[%c0_87, %c0_88, %c0_89, %c0_90] : memref<1x1x1x128xf32, #tpu.memory_space<vmem>>, vector<1x1x1x128xf32>
      %91 = vector.shape_cast %90 : vector<1x1x1x128xf32> to vector<1x128xf32>
      %cst_91 = arith.constant dense<0.000000e+00> : vector<128xf32>
      %92 = vector.multi_reduction <add>, %89, %cst_91 [0] : vector<8x128xf32> to vector<128xf32>
      %93 = vector.shape_cast %92 : vector<128xf32> to vector<1x128xf32>
      %94 = arith.addf %91, %93 : vector<1x128xf32>
      %c0_92 = arith.constant 0 : index
      %c0_93 = arith.constant 0 : index
      %c0_94 = arith.constant 0 : index
      %c0_95 = arith.constant 0 : index
      %95 = vector.load %arg6[%c0_92, %c0_93, %c0_94, %c0_95] : memref<1x1x1x128xf32, #tpu.memory_space<vmem>>, vector<1x1x1x128xf32>
      %96 = vector.shape_cast %95 : vector<1x1x1x128xf32> to vector<1x128xf32>
      %97 = vector.shape_cast %94 : vector<1x128xf32> to vector<1x1x1x128xf32>
      tpu.vector_store %arg6[%c0_92, %c0_93, %c0_94, %c0_95], %97 {strides = array<i32>} : memref<1x1x1x128xf32, #tpu.memory_space<vmem>>, vector<1x1x1x128xf32>,
      %c0_96 = arith.constant 0 : index
      %c0_97 = arith.constant 0 : index
      %c0_98 = arith.constant 0 : index
      %c0_99 = arith.constant 0 : index
      %98 = vector.load %arg7[%c0_96, %c0_97, %c0_98, %c0_99] : memref<1x1x1x128xf32, #tpu.memory_space<vmem>>, vector<1x1x1x128xf32>
      %99 = vector.shape_cast %98 : vector<1x1x1x128xf32> to vector<1x128xf32>
      %100 = arith.mulf %89, %89 : vector<8x128xf32>
      %cst_100 = arith.constant dense<0.000000e+00> : vector<128xf32>
      %101 = vector.multi_reduction <add>, %100, %cst_100 [0] : vector<8x128xf32> to vector<128xf32>
      %102 = vector.shape_cast %101 : vector<128xf32> to vector<1x128xf32>
      %103 = arith.addf %99, %102 : vector<1x128xf32>
      %c0_101 = arith.constant 0 : index
      %c0_102 = arith.constant 0 : index
      %c0_103 = arith.constant 0 : index
      %c0_104 = arith.constant 0 : index
      %104 = vector.load %arg7[%c0_101, %c0_102, %c0_103, %c0_104] : memref<1x1x1x128xf32, #tpu.memory_space<vmem>>, vector<1x1x1x128xf32>
      %105 = vector.shape_cast %104 : vector<1x1x1x128xf32> to vector<1x128xf32>
      %106 = vector.shape_cast %103 : vector<1x128xf32> to vector<1x1x1x128xf32>
      tpu.vector_store %arg7[%c0_101, %c0_102, %c0_103, %c0_104], %106 {strides = array<i32>} : memref<1x1x1x128xf32, #tpu.memory_space<vmem>>, vector<1x1x1x128xf32>,
    }
    %c8_i32_10 = arith.constant 8 : i32
    return
  }
  func.func @transform_0(%arg0: i32, %arg1: i32) -> (i32, i32, i32, i32, i32) {
    %c0_i32 = arith.constant 0 : i32
    %c0_i32_0 = arith.constant 0 : i32
    %c0_i32_1 = arith.constant 0 : i32
    %c0_i32_2 = arith.constant 0 : i32
    return %arg0, %arg1, %c0_i32, %c0_i32_0, %c0_i32_1 : i32, i32, i32, i32, i32
  }
  func.func @transform_1(%arg0: i32, %arg1: i32) -> (i32, i32, i32) {
    %c0_i32 = arith.constant 0 : i32
    %c0_i32_0 = arith.constant 0 : i32
    %c0_i32_1 = arith.constant 0 : i32
    %c0_i32_2 = arith.constant 0 : i32
    return %c0_i32, %c0_i32_0, %c0_i32_1 : i32, i32, i32
  }
  func.func @transform_2(%arg0: i32, %arg1: i32) -> (i32, i32) {
    %c0_i32 = arith.constant 0 : i32
    %c0_i32_0 = arith.constant 0 : i32
    %c0_i32_1 = arith.constant 0 : i32
    return %c0_i32, %c0_i32_0 : i32, i32
  }
  func.func @transform_3(%arg0: i32, %arg1: i32) -> (i32, i32, i32, i32, i32) {
    %c0_i32 = arith.constant 0 : i32
    %c0_i32_0 = arith.constant 0 : i32
    %c0_i32_1 = arith.constant 0 : i32
    %c0_i32_2 = arith.constant 0 : i32
    return %arg0, %arg1, %c0_i32, %c0_i32_0, %c0_i32_1 : i32, i32, i32, i32, i32
  }
  func.func @transform_4(%arg0: i32, %arg1: i32) -> (i32, i32, i32, i32) {
    %c0_i32 = arith.constant 0 : i32
    %c0_i32_0 = arith.constant 0 : i32
    %c0_i32_1 = arith.constant 0 : i32
    return %arg0, %arg1, %c0_i32, %c0_i32_0 : i32, i32, i32, i32
  }
  func.func @transform_5(%arg0: i32, %arg1: i32) -> (i32, i32, i32, i32) {
    %c0_i32 = arith.constant 0 : i32
    %c0_i32_0 = arith.constant 0 : i32
    %c0_i32_1 = arith.constant 0 : i32
    return %arg0, %arg1, %c0_i32, %c0_i32_0 : i32, i32, i32, i32
  }
}

</mosaic_0001>

<bundles_post_ra>
// kernel: tpu_custom_call.1
= control target key start
LH: loop header
LB: loop body
LE: loop exit
PB: predicated region body
PF: predicated region fallthrough
CT: control target
= control target key end

     0   :  { %s2119_s0 = inlined_call_operand.vmem [shape: bf16[2,1,10,10,128], index: 0, kind: input, shape index: {}]   ;;  %s2120_s1 = inlined_call_operand.vmem [shape: bf16[9,40,128], index: 1, kind: input, shape index: {}]   ;;  %s2121_s2 = inlined_call_operand.vmem [shape: f32[1,128], index: 2, kind: input, shape index: {}]   ;;  %s2122_s3 = inlined_call_operand.hbm [shape: bf16[2,1,8,8,128], index: 3, kind: output, shape index: {0}]   ;;  %s2123_s4 = inlined_call_operand.hbm [shape: f32[2,1,1,128], index: 4, kind: output, shape index: {1}]   ;;  %s2124_s5 = inlined_call_operand.hbm [shape: f32[2,1,1,128], index: 5, kind: output, shape index: {2}]  }
   0x1   :  { %2127 = sst [smem:[#allocation9_spill]] %s2119_s0 }
   0x2   :  { %2128 = sst [smem:[#allocation10_spill]] %s2121_s2 }
   0x3   :  { %11 = vsyncpa [#allocation3], 0 }
   0x4   :  { %13 = vsyncpa [#allocation3 + $0x1], 0 }
   0x5   :  { %14 = vsyncpa [#allocation5], 0 }
   0x6   :  { %16 = vsyncpa [#allocation5 + $0x1], 0  ;;  %s1734_s18 = smov 0   ;;  %s1736_s19 = smov 0  }
   0x7   :  { %s1738_s20 = smov 0   ;;  %s1740_s21 = smov 0  }
   0x8   :  { %s1742_s22 = smov 0   ;;  %s1744_s23 = smov 0  }
   0x9 LB: > { %s2126_s24 = sadd.s32 4294967295, %s1690_s23   ;;  %s2125_s25 = sadd.s32 4294967294, %s1690_s23   ;;  %s1690_s23 = sphi %s1744_s23, %s22_s23   ;;  %s1686_s22 = sphi %s1742_s22, %s2139_s22   ;;  %s1682_s21 = sphi %s1740_s21, %s2138_s21   ;;  %s1678_s20 = sphi %s1738_s20, %s2137_s20   ;;  %s1674_s19 = sphi %s1736_s19, %s2136_s19   ;;  %s1670_s18 = sphi %s1734_s18, %s2135_s18  }
   0xa   : > { %s34_s26 = sadd.s32 1, %s1686_s22  ;;  %s113_s27 = sadd.s32 1, %s1678_s20 }
   0xb   : > { %p36_p0 = scmp.ge.s32.totalorder %s34_s26, 2  ;;  %p123_p1 = scmp.ne.s32.totalorder %s1678_s20, %s1674_s19 }
   0xc   : > { %p124_p2 = scmp.eq.s32.totalorder %s2126_s24, 1  ;;  %p129_p3 = scmp.ne.s32.totalorder %s1674_s19, %s1670_s18 }
   0xd   : > { %s2141_s26 = smov (%p36_p0, %s34_s26), 0  ;;  %p130_p5 = scmp.eq.s32.totalorder %s2125_s25, 1 }
   0xe   : > { %p1776_p4 = por %p124_p2, %p123_p1  ;;  %s108_s29 = ssub.s32 %s1686_s22, %s2141_s26 }
   0xf   : > { %p1202_p6 = scmp.ge.s32.totalorder %s1690_s23, 1  ;;  %p111_p7 = scmp.eq.s32.totalorder %s108_s29, 0 }
  0x10   : > { %p1785_p8 = por %p130_p5, %p129_p3  ;;  %p222_p9 = scmp.lt.s32.totalorder %s1690_s23, 3 }
  0x11   : > { %s1791_s6 = scalar_select %p111_p7, %s1678_s20, %s113_s27  }
  0x12   : > { %p223_p10 = pnand %p1202_p6, %p222_p9 }
  0x13   : > { %s1794_s7 = sand.u32 (!%p223_p10), 1, %s1674_s19   ;;  %p262_p11 = scmp.lt.s32.totalorder (!%p223_p10), %s1682_s21, 1  ;;  %v1696_v1 = vmov (!%p223_p10), 0.0  }
  0x14   : > { %226 = sbr.rel (%p223_p10) target bundleno = 393 (0x189), region = 32  ;;  %s2131_s2 = sld [smem:[#allocation10_spill]] (!%p223_p10) }
  0x15   : > { %s1203_s10 = sshll.u32 (!%p223_p10), %s1794_s7, 5  ;;  %s1804_s11 = scalar_lea.vmem (!%p223_p10), [#allocation4], %s1794_s7 }
  0x16   : > { %273 = vst [vmem:[%s1804_s11] sm:$0x1] (!%p223_p10), %v1696_v1  ;;  %s1809_s13 = scalar_lea.vmem (!%p223_p10), [#allocation6], %s1794_s7  ;;  %s2132_s0 = sld [smem:[#allocation9_spill]] (!%p223_p10) }
  0x17   : > { %274 = vst [vmem:[%s1809_s13] sm:$0x1] (!%p223_p10), %v1696_v1  ;;  %s1817_s27 = scalar_lea.vmem (!%p223_p10), [#allocation2], %s1203_s10  ;;  %s1819_s29 = smov (!%p223_p10), 0  }
  0x1a   : > { %v1800_v0 = vld [vmem:[%s2131_s2] ss:$0 sm:$0xff] (!%p223_p10) }
  0x1b   : > { %s263_s12 = scalar_select %p262_p11, %s1682_s21, 1 }
  0x1d   : > { %s1436_s14 = smul.u32 80, %s263_s12 }
  0x1f   : > { %s1815_s17 = scalar_lea.vmem %s2132_s0, %s1436_s14 }
  0x20 LB: >> { %v1515_v2 = vld [vmem:[%s2120_s1 + $0x14] sm:$0xff]   ;;  %v1697_v3 = vmov 0.0   ;;  %v1516_v4 = vld [vmem:[%s2120_s1] sm:$0xff]   ;;  %vm328_vm0 = vcmask 1043456   ;;  %v1518_v6 = vld [vmem:[%s2120_s1 + $0x8] sm:$0xff]   ;;  %s1308_s9 = sshll.u32 %s1694_s29, 3  ;;  %s1694_s29 = sphi %s1819_s29, %s280_s29  }
  0x21   : >> { %1346 = vmatprep.subr.bf16.mxu0 %v1697_v3  ;;  %1356 = vmatprep.subr.bf16.mxu1 %v1697_v3  ;;  %v1517_v5 = vld [vmem:[%s2120_s1 + $0x1c] sm:$0xff]   ;;  %v1519_v7 = vld [vmem:[%s2120_s1 + $0x24] ss:$0 sps:$4 sm:$0xff]   ;;  %vm1698_vm1 = vmmov 0   ;;  %s1847_s10 = scalar_lea.vmem %s1815_s17, %s1308_s9  ;;  %v1520_v8 = vld [vmem:[%s2120_s1 + $0x10] ss:$0 sps:$4 sm:$0xff]  }
  0x22   : >> { %1347 = vmatpush3.bf16.msra.mxu0 %v1515_v2  ;;  %1357 = vmatpush3.bf16.msra.mxu1 %v1516_v4  ;;  %v284_v9 = vld [vmem:[%s1847_s10] sm:$0xf]  ;;  %v290_v10 = vld [vmem:[%s1847_s10 + $0x4] sm:$0x1]  ;;  %v330_v12 = vsel %vm328_vm0, %v1519_v7, 0  ;;  %v391_v13 = vsel %vm328_vm0, %v1520_v8, 0 }
  0x23   : >> { %1348 = vmatprep.subr.bf16.mxu0 %v1697_v3  ;;  %1358 = vmatprep.subr.bf16.mxu1 %v1697_v3  ;;  %v1212_v11 = vcombine.low %v284_v9, %v290_v10  ;;  %vm324_vm2 = vcmask 326656   ;;  %v1522_v17 = vld [vmem:[%s2120_s1 + $0x28] sm:$0xff]   ;;  %v1523_v18 = vld [vmem:[%s2120_s1 + $0x3c] sm:$0xff]   ;;  %v1524_v20 = vld [vmem:[%s2120_s1 + $0x30] sm:$0xff]  }
  0x24   : >> { %1352 = vmatprep.mubr.msk.bf16.mxu0 %vm1698_vm1, %v1697_v3  ;;  %1362 = vmatprep.mubr.msk.bf16.mxu1 %vm1698_vm1, %v1697_v3  ;;  %v1525_v21 = vld [vmem:[%s2120_s1 + $0x44] sm:$0xff]   ;;  %v1526_v22 = vld [vmem:[%s2120_s1 + $0x38] ss:$0 sps:$4 sm:$0xff]   ;;  %v1527_v23 = vld [vmem:[%s2120_s1 + $0x4c] ss:$0 sps:$4 sm:$0xff]  }
  0x25   : >> { %v303_v14 = vshrl.u32 %v1212_v11, 16  ;;  %v305_v15 = vshll.u32 %v1212_v11, 16  ;;  %v433_v24 = vld [vmem:[%s1847_s10] sm:$0xe]  ;;  %v463_v25 = vsel %vm328_vm0, %v1526_v22, 0  ;;  %v536_v26 = vsel %vm328_vm0, %v1527_v23, 0 }
  0x26   : >> { %1349 = vmatpush3.bf16.msra.mxu0 %v1517_v5  ;;  %1359 = vmatpush3.bf16.msra.mxu1 %v1518_v6  ;;  %v1226_v27 = vcombine.low %v433_v24, %v290_v10  ;;  %v1242_v28 = vld [vmem:[%s1847_s10 + $0x8] sm:$0xf]  ;;  %v1243_v29 = vld [vmem:[%s1847_s10 + $0xc] sm:$0x1]  ;;  %v1529_v31 = vld [vmem:[%s2120_s1 + $0x50] sm:$0xff]  }
  0x27   : >> { %1350 = vmatprep.subr.bf16.mxu0 %v1697_v3  ;;  %1360 = vmatprep.subr.bf16.mxu1 %v1697_v3  ;;  %v307_v16 = vrot.slane %v305_v15, 1  ;;  %v1249_v32 = vcombine.low %v1242_v28, %v1243_v29  ;;  %v1232_v33 = vld [vmem:[%s1847_s10 + $0x8] sm:$0xf]  ;;  %v1531_v35 = vld [vmem:[%s2120_s1 + $0x58] sm:$0xff]   ;;  %v1532_v36 = vld [vmem:[%s2120_s1 + $0x6c] sm:$0xff]  }
  0x28   : >> { %v443_v30 = vrot.slane %v1226_v27, 1  ;;  %v1530_v34 = vld [vmem:[%s2120_s1 + $0x64] sm:$0xff]   ;;  %v1533_v39 = vld [vmem:[%s2120_s1 + $0x60] ss:$0 sps:$4 sm:$0xff]   ;;  %v1534_v40 = vld [vmem:[%s2120_s1 + $0x74] ss:$0 sps:$4 sm:$0xff]  }
  0x29   : >> { %v308_v19 = vor.u32 %v307_v16, %v303_v14  ;;  %v595_v37 = vshll.u32 %v1249_v32, 16  ;;  %v1254_v38 = vld [vmem:[%s1847_s10 + $0x8] sm:$0xe]  ;;  %v593_v41 = vshrl.u32 %v1249_v32, 16  ;;  %v1276_v44 = vld [vmem:[%s1847_s10 + $0x10] sm:$0xf] }
  0x2a   : >> { %1351 = vmatpush3.bf16.msra.mxu0 %v330_v12  ;;  %1361 = vmatpush3.bf16.msra.mxu1 %v391_v13  ;;  %v1260_v43 = vcombine.low %v1254_v38, %v1243_v29  ;;  %v1277_v45 = vld [vmem:[%s1847_s10 + $0x14] sm:$0x1]  ;;  %v618_v46 = vsel %vm328_vm0, %v1533_v39, 0  ;;  %v691_v47 = vsel %vm328_vm0, %v1534_v40, 0  ;;  %v1536_v51 = vld [vmem:[%s2120_s1 + $0x78] sm:$0xff]   ;;  %v1538_v52 = vld [vmem:[%s2120_s1 + $0x8c] sm:$0xff]  }
  0x2b   : >> { %1366 = vmatprep.subr.bf16.mxu0 %v1697_v3  ;;  %1376 = vmatprep.subr.bf16.mxu1 %v1697_v3  ;;  %v597_v42 = vrot.slane %v595_v37, 1  ;;  %v1283_v50 = vcombine.low %v1276_v44, %v1277_v45  ;;  %v1539_v54 = vld [vmem:[%s2120_s1 + $0x80] sm:$0xff]   ;;  %v1540_v55 = vld [vmem:[%s2120_s1 + $0x94] sm:$0xff]   ;;  %v1541_v56 = vld [vmem:[%s2120_s1 + $0x88] ss:$0 sps:$4 sm:$0xff]  }
  0x2c   : >> { %v671_v49 = vrot.slane %v1260_v43, 1  ;;  %v1542_v57 = vld [vmem:[%s2120_s1 + $0x9c] ss:$0 sps:$4 sm:$0xff]   ;;  %v764_v60 = vsel %vm328_vm0, %v1541_v56, 0  ;;  %v1266_v63 = vld [vmem:[%s1847_s10 + $0x10] sm:$0xf] }
  0x2d   : >> { %1353 = vmatmul.mubr.msk.bf16.vlgmr.msra.gmra.mrb[0].mxu0 %vm324_vm2, %v308_v19  ;;  %1363 = vmatmul.mubr.msk.bf16.vlgmr.msra.gmra.mrb[0].mxu1 %vm324_vm2, %v284_v9  ;;  %v598_v48 = vor.u32 %v597_v42, %v593_v41  ;;  %v823_v53 = vshll.u32 %v1283_v50, 16  ;;  %v821_v58 = vshrl.u32 %v1283_v50, 16  ;;  %v846_v61 = vsel %vm328_vm0, %v1542_v57, 0  ;;  %v1543_v1 = vld [vmem:[%s2120_s1 + $0xa0] sm:$0xff]   ;;  %v1545_v2 = vld [vmem:[%s2120_s1 + $0xa8] sm:$0xff]  }
  0x2e   : >> { %1367 = vmatpush3.bf16.msra.mxu0 %v1522_v17  ;;  %1377 = vmatpush3.bf16.msra.mxu1 %v1523_v18  ;;  %v1288_v4 = vld [vmem:[%s1847_s10 + $0x10] sm:$0xe]  ;;  %v1546_v5 = vld [vmem:[%s2120_s1 + $0xb0] ss:$0 sps:$4 sm:$0xff]   ;;  %s1300_s10 = sshll.u32 %s1694_s29, 2  ;;  %s280_s29 = sadd.s32 1, %s1694_s29  }
  0x2f   : >> { %1368 = vmatprep.subr.bf16.mxu0 %v1697_v3  ;;  %1378 = vmatprep.subr.bf16.mxu1 %v1697_v3  ;;  %v825_v59 = vrot.slane %v823_v53, 1  ;;  %v1294_v6 = vcombine.low %v1288_v4, %v1277_v45  ;;  %v919_v7 = vsel %vm328_vm0, %v1546_v5, 0  ;;  %s971_s0 = scalar_lea.vmem %s1817_s27, %s1300_s10 [#allocation2]  ;;  %v975_v4 = vld [vmem:[%s1804_s11] sm:$0x1]  ;;  %p277_p12 = scmp.ge.s32.totalorder %s280_s29, 8  }
  0x30   : >> { %1372 = vmatprep.mubr.msk.bf16.mxu0 %vm1698_vm1, %v1697_v3  ;;  %1382 = vmatprep.mubr.msk.bf16.mxu1 %vm1698_vm1, %v1697_v3  ;;  %s2133_s2 = sadd.s32 (%p277_p12), 4294967295, %s1690_s23   ;;  %s1304_s16 = sshll.u32 (%p277_p12), %s1682_s21, 4 }
  0x31   : >> { %v826_v62 = vor.u32 %v825_v59, %v821_v58  ;;  %v899_v8 = vrot.slane %v1294_v6, 1  ;;  %s1996_s15 = sand.u32 (%p277_p12), 1, %s2133_s2   ;;  %s2004_s12 = scalar_lea.hbm (%p277_p12), %s2123_s4, %s1304_s16 }
  0x32   : >> { %1369 = vmatpush3.bf16.msra.mxu0 %v1524_v20  ;;  %1379 = vmatpush3.bf16.msra.mxu1 %v1525_v21  ;;  %s1035_s14 = sshll.u32 (%p277_p12), %s1804_s11, 4  ;;  %s1309_s17 = sshll.u32 (%p277_p12), %s1682_s21, 9  ;;  %s2007_s14 = int_to_ptr.vmem [resolvable:$true] %s1035_s14 }
  0x33   : >> { %1370 = vmatprep.subr.bf16.mxu0 %v1697_v3  ;;  %1380 = vmatprep.subr.bf16.mxu1 %v1697_v3  ;;  %s1000_s29 = scalar_lea.sflag (%p277_p12), [#allocation5], %s1996_s15  ;;  %s1548_s24 = scalar_lea.vmem (%p277_p12), %s2007_s14, 16 }
  0x34   : > { %p1549_p13 = scmp.ne.s32.totalorder (%p277_p12), %s2007_s14, %s1548_s24  ;;  %s1699_s25 = smov (%p277_p12), [#allocation4]  }
  0x35   : > { %s1552_s10 = sshll.u32 (%p277_p12), %s1699_s25, 4  ;;  %s1553_s10 = int_to_ptr.vmem [resolvable:$false] %s1552_s10 }
  0x36   : >> { %1371 = vmatpush3.bf16.msra.mxu0 %v463_v25  ;;  %1381 = vmatpush3.bf16.msra.mxu1 %v536_v26  ;;  %p1550_p0 = pnand (%p277_p12), %p1549_p13, %p1776_p4  ;;  %p1555_p2 = scmp.lt.s32.totalorder (%p277_p12), %s2007_s14, %s1553_s10 }
  0x37   : >> { %1386 = vmatprep.subr.bf16.mxu0 %v1697_v3  ;;  %1396 = vmatprep.subr.bf16.mxu1 %v1697_v3 }
  0x38   : > { %p1551_p1 = pneg (%p277_p12), %p1550_p0 }
  0x39   : >> { %1373 = vmatmul.mubr.msk.bf16.vlgmr.msra.gmra.mrb[4].mxu0 %vm324_vm2, %v443_v30  ;;  %1383 = vmatmul.mubr.msk.bf16.vlgmr.msra.gmra.mrb[4].mxu1 %vm324_vm2, %v1232_v33 }
  0x3a   : >> { %1387 = vmatpush3.bf16.msra.mxu0 %v1529_v31  ;;  %1397 = vmatpush3.bf16.msra.mxu1 %v1530_v34 }
  0x3b   : >> { %1388 = vmatprep.subr.bf16.mxu0 %v1697_v3  ;;  %1398 = vmatprep.subr.bf16.mxu1 %v1697_v3 }
  0x3c   : >> { %1392 = vmatprep.mubr.msk.bf16.mxu0 %vm1698_vm1, %v1697_v3  ;;  %1402 = vmatprep.mubr.msk.bf16.mxu1 %vm1698_vm1, %v1697_v3 }
  0x3e   : >> { %1389 = vmatpush3.bf16.msra.mxu0 %v1531_v35  ;;  %1399 = vmatpush3.bf16.msra.mxu1 %v1532_v36 }
  0x3f   : >> { %1390 = vmatprep.subr.bf16.mxu0 %v1697_v3  ;;  %1400 = vmatprep.subr.bf16.mxu1 %v1697_v3 }
  0x42   : >> { %1391 = vmatpush3.bf16.msra.mxu0 %v618_v46  ;;  %1401 = vmatpush3.bf16.msra.mxu1 %v691_v47 }
  0x43   : >> { %1406 = vmatprep.subr.bf16.mxu0 %v1697_v3  ;;  %1416 = vmatprep.subr.bf16.mxu1 %v1697_v3 }
  0x45   : >> { %1393 = vmatmul.mubr.msk.bf16.vlgmr.msra.gmra.mrb[8].mxu0 %vm324_vm2, %v598_v48  ;;  %1403 = vmatmul.mubr.msk.bf16.vlgmr.msra.gmra.mrb[8].mxu1 %vm324_vm2, %v671_v49 }
  0x46   : >> { %1407 = vmatpush3.bf16.msra.mxu0 %v1536_v51  ;;  %1417 = vmatpush3.bf16.msra.mxu1 %v1538_v52 }
  0x47   : >> { %1408 = vmatprep.subr.bf16.mxu0 %v1697_v3  ;;  %1418 = vmatprep.subr.bf16.mxu1 %v1697_v3 }
  0x48   : >> { %1412 = vmatprep.mubr.msk.bf16.mxu0 %vm1698_vm1, %v1697_v3  ;;  %1422 = vmatprep.mubr.msk.bf16.mxu1 %vm1698_vm1, %v1697_v3 }
  0x4a   : >> { %1409 = vmatpush3.bf16.msra.mxu0 %v1539_v54  ;;  %1419 = vmatpush3.bf16.msra.mxu1 %v1540_v55 }
  0x4b   : >> { %1410 = vmatprep.subr.bf16.mxu0 %v1697_v3  ;;  %1420 = vmatprep.subr.bf16.mxu1 %v1697_v3 }
  0x4e   : >> { %1411 = vmatpush3.bf16.msra.mxu0 %v764_v60  ;;  %1421 = vmatpush3.bf16.msra.mxu1 %v846_v61 }
  0x4f   : >> { %1426 = vmatprep.subr.bf16.mxu0 %v1697_v3 }
  0x51   : >> { %1413 = vmatmul.mubr.msk.bf16.vlgmr.msra.gmra.mrb[12].mxu0 %vm324_vm2, %v1266_v63  ;;  %1423 = vmatmul.mubr.msk.bf16.vlgmr.msra.gmra.mrb[12].mxu1 %vm324_vm2, %v826_v62 }
  0x52   : >> { %1427 = vmatpush3.bf16.msra.mxu0 %v1543_v1  ;;  %1432 = vmatprep.mubr.msk.bf16.mxu0 %vm1698_vm1, %v1697_v3 }
  0x53   : >> { %1428 = vmatprep.subr.bf16.mxu0 %v1697_v3 }
  0x56   : >> { %1429 = vmatpush3.bf16.msra.mxu0 %v1545_v2 }
  0x57   : >> { %1430 = vmatprep.subr.bf16.mxu0 %v1697_v3 }
  0x5a   : >> { %1431 = vmatpush3.bf16.msra.mxu0 %v919_v7  ;;  %v984_v7 = vld [vmem:[%s1809_s13] sm:$0x1] }
  0x5d   : >> { %1433 = vmatmul.mubr.msk.bf16.vlgmr.msra.gmra.mrb[16].mxu0 %vm324_vm2, %v899_v8 }
 0x100   : >> { %v366_v9 = vpop.f32.mrb[0].mxu0  ;;  %v427_v10 = vpop.f32.mrb[0].mxu1 }
 0x101   : >> { %v1354_v11 = vpop.f32.mrb[1].mxu0  ;;  %v428_v12 = vadd.f32 %v427_v10, %v366_v9  ;;  %v1364_v13 = vpop.f32.mrb[1].mxu1 }
 0x102   : >> { %v369_v14 = vpop.f32.mrb[2].mxu0  ;;  %v430_v15 = vpop.f32.mrb[2].mxu1 }
 0x103   : >> { %v1355_v16 = vpop.f32.mrb[3].mxu0  ;;  %v1365_v17 = vpop.f32.mrb[3].mxu1 }
 0x10c   : >> { %v499_v18 = vpop.f32.mrb[4].mxu0  ;;  %v572_v19 = vpop.f32.mrb[4].mxu1 }
 0x10d   : >> { %v505_v20 = vadd.f32 %v499_v18, %v428_v12  ;;  %v1374_v21 = vpop.f32.mrb[5].mxu0  ;;  %v1384_v3 = vpop.f32.mrb[5].mxu1 }
 0x10e   : >> { %v502_v22 = vpop.f32.mrb[6].mxu0  ;;  %v575_v23 = vpop.f32.mrb[6].mxu1 }
 0x10f   : >> { %v578_v24 = vadd.f32 %v572_v19, %v505_v20  ;;  %v1375_v25 = vpop.f32.mrb[7].mxu0  ;;  %v1385_v26 = vpop.f32.mrb[7].mxu1 }
 0x118   : >> { %v654_v27 = vpop.f32.mrb[8].mxu0  ;;  %v727_v28 = vpop.f32.mrb[8].mxu1 }
 0x119   : >> { %v660_v29 = vadd.f32 %v654_v27, %v578_v24  ;;  %v1394_v30 = vpop.f32.mrb[9].mxu0  ;;  %v1404_v31 = vpop.f32.mrb[9].mxu1 }
 0x11a   : >> { %v657_v32 = vpop.f32.mrb[10].mxu0  ;;  %v730_v33 = vpop.f32.mrb[10].mxu1 }
 0x11b   : >> { %v733_v34 = vadd.f32 %v727_v28, %v660_v29  ;;  %v1395_v35 = vpop.f32.mrb[11].mxu0  ;;  %v1405_v36 = vpop.f32.mrb[11].mxu1 }
 0x124   : >> { %v800_v37 = vpop.f32.mrb[12].mxu0  ;;  %v882_v38 = vpop.f32.mrb[12].mxu1 }
 0x125   : >> { %v806_v39 = vadd.f32 %v800_v37, %v733_v34  ;;  %v1414_v40 = vpop.f32.mrb[13].mxu0  ;;  %v1424_v41 = vpop.f32.mrb[13].mxu1 }
 0x126   : >> { %v803_v42 = vpop.f32.mrb[14].mxu0  ;;  %v885_v43 = vpop.f32.mrb[14].mxu1 }
 0x127   : >> { %v888_v44 = vadd.f32 %v882_v38, %v806_v39  ;;  %v1415_v45 = vpop.f32.mrb[15].mxu0  ;;  %v1425_v46 = vpop.f32.mrb[15].mxu1 }
 0x130   : >> { %v955_v47 = vpop.f32.mrb[16].mxu0 }
 0x131   : >> { %v961_v48 = vadd.f32 %v955_v47, %v888_v44  ;;  %v1434_v49 = vpop.f32.mrb[17].mxu0 }
 0x132   : >> { %v958_v50 = vpop.f32.mrb[18].mxu0 }
 0x133   : >> { %v968_v51 = vadd.f32 %v1800_v0, %v961_v48  ;;  %v1435_v52 = vpop.f32.mrb[19].mxu0 }
 0x135   : >> { %v969_v53 = vpack.c.bf16 %v968_v51, %v968_v51 }
 0x137   : >> { %972 = vst [vmem:[%s971_s0] sm:$0xf] %v969_v53  ;;  %v973_v54 = vunpack.c.l.bf16 %v969_v53  ;;  %s1554_s0 = scalar_lea.vmem (%p277_p12), %s1553_s10, 32 }
 0x138   : > { %p1556_p3 = scmp.lt.s32.totalorder (%p277_p12), %s1554_s0, %s1548_s24 }
 0x139   : >> { %v974_v55 = vsub.f32 %v973_v54, %v1800_v0 }
 0x13a   : > { %p1557_p5 = por (%p277_p12), %p1556_p3, %p1555_p2 }
 0x13b   : >> { %v976_v56 = vrot.slane %v974_v55, 4  ;;  %v985_v57 = vmul.f32 %v974_v55, %v974_v55 }
 0x13c   : > { %p1558_p6 = pnand (%p277_p12), %p1557_p5, %p1551_p1 }
 0x13d   : >> { %v977_v58 = vadd.f32 %v976_v56, %v974_v55  ;;  %v986_v59 = vrot.slane %v985_v57, 4 }
 0x13f   : >> { %v978_v60 = vrot.slane %v977_v58, 2  ;;  %v987_v61 = vadd.f32 %v986_v59, %v985_v57 }
 0x141   : >> { %v979_v62 = vadd.f32 %v978_v60, %v977_v58  ;;  %v988_v63 = vrot.slane %v987_v61, 2 }
 0x143   : >> { %v980_v1 = vrot.slane %v979_v62, 1  ;;  %v989_v2 = vadd.f32 %v988_v63, %v987_v61 }
 0x145   : >> { %v981_v5 = vadd.f32 %v980_v1, %v979_v62  ;;  %v990_v6 = vrot.slane %v989_v2, 1  ;;  %279 = sbr.rel (!%p277_p12) target bundleno = 32 (0x20), region = 118 }
 0x147   : >> { %v982_v8 = vadd.f32 %v981_v5, %v975_v4  ;;  %v991_v9 = vadd.f32 %v990_v6, %v989_v2 }
 0x149   : >> { %983 = vst [vmem:[%s1804_s11] sm:$0x1] %v982_v8  ;;  %v992_v10 = vadd.f32 %v991_v9, %v984_v7 }
 0x14b   : >> { %993 = vst [vmem:[%s1809_s13] sm:$0x1] %v992_v10 }
 0x14c   : > { %1561 = shalt.err (!%p1558_p6)
}
 0x14d   : > { %s1562_s11 = scalar_lea.hbm %s2004_s12, 16  ;;  %s1566_s9 = scalar_lea.hbm %s2123_s4, 32 }
 0x14e   : > { %p1563_p7 = scmp.ne.s32.totalorder %s2004_s12, %s1562_s11  ;;  %p1567_p11 = scmp.lt.u32.totalorder %s2004_s12, %s2123_s4 }
 0x14f   : > { %p1568_p12 = scmp.lt.u32.totalorder %s1566_s9, %s1562_s11  ;;  %p1570_p0 = scmp.lt.u32.totalorder %s1562_s11, %s2004_s12 }
 0x150   : > { %p1564_p9 = pnand %p1563_p7, %p1776_p4 }
 0x151   : > { %p1569_p13 = por %p1568_p12, %p1567_p11 }
 0x152   : > { %p1565_p10 = pneg %p1564_p9 }
 0x153   : > { %p1571_p1 = por %p1570_p0, %p1569_p13 }
 0x155   : > { %p1572_p2 = pnand %p1571_p1, %p1565_p10 }
 0x157   : > { %1575 = shalt.err (!%p1572_p2)
}
 0x158   : > { %1438 = dma.vmem_to_hbm [thread:$0]  (%p1776_p4), %s2007_s14, 16, %s2004_s12, %s1000_s29  }
 0x159   : > { %s2039_s11 = scalar_lea.hbm %s2122_s3, %s1309_s17  ;;  %s1018_s2 = sshll.u32 %s1817_s27, 4  ;;  %s2042_s2 = int_to_ptr.vmem [resolvable:$true] %s1018_s2 }
 0x15a   : > { %s2049_s25 = scalar_lea.hbm %s2124_s5, %s1304_s16  ;;  %s995_s10 = scalar_lea.sflag [#allocation3], %s1794_s7 }
 0x15b   : > { %s1576_s12 = scalar_lea.vmem %s2042_s2, 512  ;;  %s1700_s14 = smov [#allocation2]  }
 0x15c   : > { %p1577_p3 = scmp.ne.s32.totalorder %s2042_s2, %s1576_s12  ;;  %s1580_s17 = sshll.u32 %s1700_s14, 4  ;;  %s1581_s17 = int_to_ptr.vmem [resolvable:$false] %s1580_s17 }
 0x15d   : > { %s1582_s27 = scalar_lea.vmem %s1581_s17, 1024  ;;  %p1583_p7 = scmp.lt.s32.totalorder %s2042_s2, %s1581_s17 }
 0x15e   : > { %p1578_p5 = pnand %p1577_p3, %p1776_p4  ;;  %p1584_p9 = scmp.lt.s32.totalorder %s1582_s27, %s1576_s12 }
 0x160   : > { %p1579_p6 = pneg %p1578_p5  ;;  %p1585_p10 = por %p1584_p9, %p1583_p7 }
 0x162   : > { %p1586_p11 = pnand %p1585_p10, %p1579_p6 }
 0x164   : > { %1589 = shalt.err (!%p1586_p11)
}
 0x165   : > { %s1590_s21 = scalar_lea.hbm %s2039_s11, 512  ;;  %s1594_s0 = scalar_lea.hbm %s2122_s3, 1024 }
 0x166   : > { %p1591_p12 = scmp.ne.s32.totalorder %s2039_s11, %s1590_s21  ;;  %p1595_p1 = scmp.lt.u32.totalorder %s2039_s11, %s2122_s3 }
 0x167   : > { %p1596_p2 = scmp.lt.u32.totalorder %s1594_s0, %s1590_s21  ;;  %p1598_p5 = scmp.lt.u32.totalorder %s1590_s21, %s2039_s11 }
 0x168   : > { %p1592_p13 = pnand %p1591_p12, %p1776_p4 }
 0x169   : > { %p1597_p3 = por %p1596_p2, %p1595_p1 }
 0x16a   : > { %p1593_p0 = pneg %p1592_p13 }
 0x16b   : > { %p1599_p6 = por %p1598_p5, %p1597_p3 }
 0x16d   : > { %p1600_p7 = pnand %p1599_p6, %p1593_p0 }
 0x16f   : > { %1603 = shalt.err (!%p1600_p7)
}
 0x170   : > { %s1701_s12 = smov 64   ;;  %s1702_s14 = smov 4  }
 0x171   : > { %1437 = dma.vmem_to_hbm [thread:$0]  (%p1776_p4), %s2042_s2, 512, %s2039_s11, %s995_s10, %s1701_s12, %s1701_s12, %s1702_s14  }
 0x172   : > { %s1049_s17 = sshll.u32 %s1809_s13, 4  ;;  %s1703_s21 = smov [#allocation6]   ;;  %s1050_s17 = int_to_ptr.vmem [resolvable:$true] %s1049_s17 }
 0x173   : > { %s1604_s27 = scalar_lea.vmem %s1050_s17, 16  ;;  %s1608_s16 = sshll.u32 %s1703_s21, 4  ;;  %s1609_s16 = int_to_ptr.vmem [resolvable:$false] %s1608_s16 }
 0x174   : > { %p1605_p9 = scmp.ne.s32.totalorder %s1050_s17, %s1604_s27  ;;  %s1610_s24 = scalar_lea.vmem %s1609_s16, 32 }
 0x175   : > { %p1611_p12 = scmp.lt.s32.totalorder %s1050_s17, %s1609_s16  ;;  %p1612_p13 = scmp.lt.s32.totalorder %s1610_s24, %s1604_s27 }
 0x176   : > { %p1606_p10 = pnand %p1605_p9, %p1776_p4 }
 0x177   : > { %p1613_p0 = por %p1612_p13, %p1611_p12 }
 0x178   : > { %p1607_p11 = pneg %p1606_p10 }
 0x17a   : > { %p1614_p1 = pnand %p1613_p0, %p1607_p11 }
 0x17c   : > { %1617 = shalt.err (!%p1614_p1)
}
 0x17d   : > { %s1618_s7 = scalar_lea.hbm %s2049_s25, 16  ;;  %s1622_s2 = scalar_lea.hbm %s2124_s5, 32 }
 0x17e   : > { %p1619_p2 = scmp.ne.s32.totalorder %s2049_s25, %s1618_s7  ;;  %p1623_p6 = scmp.lt.u32.totalorder %s2049_s25, %s2124_s5 }
 0x17f   : > { %p1624_p7 = scmp.lt.u32.totalorder %s1622_s2, %s1618_s7  ;;  %p1626_p10 = scmp.lt.u32.totalorder %s1618_s7, %s2049_s25 }
 0x180   : > { %p1620_p3 = pnand %p1619_p2, %p1776_p4 }
 0x181   : > { %p1625_p9 = por %p1624_p7, %p1623_p6 }
 0x182   : > { %p1621_p5 = pneg %p1620_p3 }
 0x183   : > { %p1627_p11 = por %p1626_p10, %p1625_p9 }
 0x185   : > { %p1628_p12 = pnand %p1627_p11, %p1621_p5 }
 0x187   : > { %1631 = shalt.err (!%p1628_p12)
}
 0x188   : > { %1439 = dma.vmem_to_hbm [thread:$0]  (%p1776_p4), %s1050_s17, 16, %s2049_s25, %s1000_s29  }
 0x189 PF: > { %p1453_p13 = scmp.ge.s32.totalorder %s1690_s23, 2  ;;  %s1061_s8 = sand.u32 1, %s1670_s18  }
 0x18a   : > { %s1062_s9 = scalar_lea.sflag [#allocation3], %s1061_s8 }
 0x18b   : > { %p1444_p0 = pnand %p1453_p13, %p1785_p8 }
 0x18d   : > { %1661 = dma.done.wait (!%p1444_p0), %s1062_s9, 512  }
 0x18e   : > { %1663 = vsyncadd (!%p1444_p0), %s1062_s9, 4294966784  ;;  %s2134_s12 = sadd.s32 4294967294, %s1690_s23  }
 0x18f   : > { %s1070_s14 = sand.u32 1, %s2134_s12  }
 0x190   : > { %s1071_s27 = scalar_lea.sflag [#allocation5], %s1070_s14 }
 0x191   : > { %1665 = dma.done.wait (!%p1444_p0), %s1071_s27, 32  }
 0x192   : > { %1667 = vsyncadd (!%p1444_p0), %s1071_s27, 4294967264  ;;  %s22_s23 = sadd.s32 1, %s1690_s23   ;;  %s2135_s18 = smov %s1674_s19 }
 0x193   : > { %p19_p4 = scmp.ge.s32.totalorder %s22_s23, 4   ;;  %s2136_s19 = smov %s1678_s20 }
 0x194   : > { %s2137_s20 = smov %s1791_s6  ;;  %s2138_s21 = smov %s1686_s22 }
 0x195   : > { %s2139_s22 = smov %s2141_s26  ;;  %21 = sbr.rel (!%p19_p4) target bundleno = 9 (0x9), region = 129 }
 0x19c   :  { %1083 = vsyncpa [#allocation3], 1 }
 0x19d   :  { %1085 = vsyncpa [#allocation3 + $0x1], 1 }
 0x19e   :  { %1086 = vsyncpa [#allocation5], 1 }
 0x19f   :  { %1088 = vsyncpa [#allocation5 + $0x1], 1 }

</bundles_post_ra>
